<compile_context>
chip_gen: v6e
topology: v6e:2x2x1
jax: 0.10.0
libtpu: 0.0.40
codegen_flags: <defaults>
</compile_context>

<pallas_src>
import functools

import jax
import jax.numpy as jnp
from jax.experimental import pallas as pl
from jax.experimental.pallas import tpu as pltpu


def _round_up(x, m):
    return (x + m - 1) // m * m


def _layout(s_dim, a_dim, p_dim, T):
    """Static lane layout shared by pack_params / wrapper / kernel."""
    k_in = _round_up(s_dim + T * a_dim + p_dim, 128)   # x-slab lanes / W_in rows
    n_in = s_dim + T * s_dim + s_dim                   # state_proj | act_proj_0..T-1 | lat_proj
    rec_off = _round_up(n_in, 128)                     # recurrent weights start lane-tile aligned
    n_rec = 7 * s_dim                                  # wfc_s | w1 | w2 | wgate(4s)
    n_aux = _round_up(2 * s_dim + 1, 128)              # bfc | wr | br
    return k_in, n_in, rec_off, n_rec, n_aux


def _pred_net_kernel(x_ref, w_ref, aux_ref, preds_ref, rew_ref, *, T, s_dim):
    """Whole pred_net forward in one kernel (single grid point).

    x_ref    : [B, k_in]            f32  = [state | act (B, T*a) | latent | 0-pad]
    w_ref    : [k_in, rec_off + 7s] bf16 packed weight slab
    aux_ref  : [1, n_aux]           f32  = [bfc | wr | br | 0-pad]
    preds_ref: [B, T*s]             f32  (lane-dense)
    rew_ref  : [B, T]               f32
    """
    s = s_dim
    n_in = s + T * s + s
    rec_off = _round_up(n_in, 128)
    bf16 = jnp.bfloat16

    w_all = w_ref[...]
    w_in = w_all[:, :n_in]                 # [k_in, s + T*s + s]  (input-side block)
    w_rec = w_all[:s, rec_off:]            # [s, 7s]              (recurrent block)
    wfc_s = w_rec[:, 0 * s:1 * s]
    w1 = w_rec[:, 1 * s:2 * s]             # pre-summed fc1 halves (input == h_cur)
    w2 = w_rec[:, 2 * s:3 * s]
    wgate = w_rec[:, 3 * s:]               # [s, 4s] fused i|f|o|g

    aux = aux_ref[...]
    bfc = aux[:, 0:s]                      # [1, s]
    wr = aux[:, s:2 * s]                   # [1, s] reward row (VPU path)
    br = aux[:, 2 * s:2 * s + 1]           # [1, 1]

    def mm(x, w):
        # bf16 MXU operands, f32 accumulation.
        # TODO(synk): validate bf16 activation drift if T / s_dim ever grow; the
        # MXU is latency-bound at M=2, so switching the activation operand to
        # f32 is nearly free if accuracy ever trumps the marginal latency.
        return jnp.dot(x.astype(bf16), w, preferred_element_type=jnp.float32)

    # ---- ONE MXU pass for every loop-invariant input-side projection ----
    in_proj = mm(x_ref[...], w_in)                   # [B, n_in]
    state_proj = in_proj[:, 0:s]
    lat_bias = in_proj[:, s + T * s:] + bfc          # latent @ wfc_p + bfc, hoisted

    def act_proj(t):                                 # act[:, t, :] @ wfc_a (precomputed)
        return in_proj[:, s + t * s:s + (t + 1) * s]

    # hidden = cell = relu(fc(cat([state, act[:, 0, :], latent])))
    hidden = jnp.maximum(state_proj + act_proj(0) + lat_bias, 0.0)
    cell = hidden

    preds_cols = []
    rew_cols = []
    # T is a small static trip count -> unrolled Python loop (visible to LLO).
    for t in range(T):
        # ---- LSTMCell(input=hidden, (h_cur=hidden, c_cur=cell)), bias=False ----
        x = jnp.maximum(mm(hidden, w1), 0.0)         # fc1(cat([h, h])) == h @ (W1a+W1b)
        x = jnp.maximum(mm(x, w2), 0.0)
        cc = jnp.maximum(mm(x, wgate), 0.0)          # all 4 gates, one lane-dense matmul
        sig = jax.nn.sigmoid(cc)
        i_g = sig[:, 0 * s:1 * s]
        f_g = sig[:, 1 * s:2 * s]
        o_g = sig[:, 2 * s:3 * s]
        g_g = jnp.tanh(cc[:, 3 * s:4 * s])
        cell = f_g * cell + i_g * g_g
        hidden = o_g * jnp.tanh(cell)

        # reward head on VPU/XLU (an N=1 matmul would waste an MXU push/pop)
        rew_cols.append(jnp.sum(hidden * wr, axis=-1, keepdims=True) + br)
        preds_cols.append(hidden)

        if t < T - 1:
            # hidden = relu(fc(cat([hidden, act[:, t, :], latent]))) -- index t,
            # faithfully matching the PyTorch source.
            hidden = jnp.maximum(mm(hidden, wfc_s) + act_proj(t) + lat_bias, 0.0)

    # single lane-dense store per output instead of T masked partial stores
    preds_ref[...] = jnp.concatenate(preds_cols, axis=-1)   # [B, T*s]
    rew_ref[...] = jnp.concatenate(rew_cols, axis=-1)       # [B, T]


@jax.jit
def pred_net_forward(state, act_sequence, latent, w_slab, aux_slab):
    """state: [B, s], act_sequence: [B, T, a], latent: [B, p];
    (w_slab, aux_slab) come from pack_params (packed once, off the hot path).
    Returns (preds [T*B, s], rewards [T*B, 1]) matching torch.cat(..., dim=0)."""
    B, s_dim = state.shape
    T, a_dim = act_sequence.shape[1], act_sequence.shape[2]
    k_in = w_slab.shape[0]

    # ONE activation slab: [state | act (batch-major [B, T*a]) | latent | 0-pad]
    x_slab = jnp.concatenate(
        [state, act_sequence.reshape(B, T * a_dim), latent], axis=1)
    x_slab = jnp.pad(x_slab, ((0, 0), (0, k_in - x_slab.shape[1])))

    n_in = s_dim + T * s_dim + s_dim
    flops = 2 * B * (k_in * n_in + T * 6 * s_dim * s_dim + (T - 1) * s_dim * s_dim)
    transcendentals = B * T * 6 * s_dim
    bytes_accessed = (x_slab.size * 4 + w_slab.size * 2 + aux_slab.size * 4
                      + B * T * s_dim * 4 + B * T * 4)

    kernel = functools.partial(_pred_net_kernel, T=T, s_dim=s_dim)
    preds2d, rew2d = pl.pallas_call(
        kernel,
        out_shape=(jax.ShapeDtypeStruct((B, T * s_dim), jnp.float32),
                   jax.ShapeDtypeStruct((B, T), jnp.float32)),
        in_specs=[pl.BlockSpec(memory_space=pltpu.VMEM)] * 3,
        out_specs=(pl.BlockSpec(memory_space=pltpu.VMEM),
                   pl.BlockSpec(memory_space=pltpu.VMEM)),
        cost_estimate=pl.CostEstimate(flops=flops,
                                      transcendentals=transcendentals,
                                      bytes_accessed=bytes_accessed),
    )(x_slab, w_slab, aux_slab)

    preds = preds2d.reshape(B, T, s_dim).transpose(1, 0, 2).reshape(T * B, s_dim)
    rewards = rew2d.T.reshape(T * B, 1)
    return preds, rewards


def init_params(key, s_dim, a_dim, p_dim):
    """Deterministic synthetic params, PyTorch-Linear-style uniform init.
    Stored 'logically' (weights [in, out]); packing happens once in pack_params."""
    ks = jax.random.split(key, 7)

    def lin_w(k, fan_in, fan_out):
        bound = 1.0 / float(jnp.sqrt(jnp.float32(fan_in)))
        return jax.random.uniform(k, (fan_in, fan_out), jnp.float32, -bound, bound)

    def lin_b(k, fan_in, fan_out):
        bound = 1.0 / float(jnp.sqrt(jnp.float32(fan_in)))
        return jax.random.uniform(k, (1, fan_out), jnp.float32, -bound, bound)

    in_fc = s_dim + a_dim + p_dim
    return {
        "wfc": lin_w(ks[0], in_fc, s_dim),          # pred_net.fc (with bias)
        "bfc": lin_b(ks[1], in_fc, s_dim),
        "w1": lin_w(ks[2], 2 * s_dim, s_dim),       # lstm.fc1 (no bias), [2s, s]
        "w2": lin_w(ks[3], s_dim, s_dim),           # lstm.fc2 (no bias)
        "wgate": lin_w(ks[4], s_dim, 4 * s_dim),    # lstm.W   (no bias), i|f|o|g
        "wr": lin_w(ks[5], s_dim, 1),               # reward_layer (with bias), [s, 1]
        "br": lin_b(ks[6], s_dim, 1),
    }


def pack_params(params, s_dim, a_dim, p_dim, T):
    """One-time packing: everything the kernel needs in ONE bf16 weight slab plus
    ONE small f32 aux slab (so each forward call issues only 3 input DMAs)."""
    s, a, p = s_dim, a_dim, p_dim
    k_in, n_in, rec_off, n_rec, n_aux = _layout(s, a, p, T)

    wfc = params["wfc"]
    wfc_s, wfc_a, wfc_p = wfc[:s], wfc[s:s + a], wfc[s + a:]
    # fc1 fold: pred_net always calls lstm(hidden, [hidden, cell]) so the LSTM
    # input equals h_cur  ->  fc1(cat([h, h])) == h @ (W1_top + W1_bottom).
    # If the model ever decouples input from h_cur, this fold becomes invalid.
    w1_folded = params["w1"][:s] + params["w1"][s:]

    w = jnp.zeros((k_in, rec_off + n_rec), jnp.float32)
    # W_in block: ONE matmul computes state@wfc_s, all T action projections
    # (block-diagonal wfc_a) and latent@wfc_p.
    w = w.at[0:s, 0:s].set(wfc_s)
    for t in range(T):
        w = w.at[s + t * a:s + (t + 1) * a, s + t * s:s + (t + 1) * s].set(wfc_a)
    w = w.at[s + T * a:s + T * a + p, s + T * s:n_in].set(wfc_p)
    # W_rec block: wfc_s | fc1(folded) | fc2 | fused 4-gate W.
    w = w.at[0:s, rec_off + 0 * s:rec_off + 1 * s].set(wfc_s)
    w = w.at[0:s, rec_off + 1 * s:rec_off + 2 * s].set(w1_folded)
    w = w.at[0:s, rec_off + 2 * s:rec_off + 3 * s].set(params["w2"])
    w = w.at[0:s, rec_off + 3 * s:rec_off + n_rec].set(params["wgate"])

    aux = jnp.zeros((1, n_aux), jnp.float32)
    aux = aux.at[:, 0:s].set(params["bfc"])
    aux = aux.at[:, s:2 * s].set(params["wr"].T)
    aux = aux.at[0, 2 * s].set(params["br"][0, 0])

    return w.astype(jnp.bfloat16), aux


def pred_net_reference(state, act_sequence, latent, params):
    """Pure-JAX f32 reference mirroring the PyTorch forward exactly."""
    wfc, bfc = params["wfc"], params["bfc"]
    w1, w2, wgate = params["w1"], params["w2"], params["wgate"]
    wr, br = params["wr"], params["br"]
    s = state.shape[1]
    T = act_sequence.shape[1]

    def fc(xs, xa, xp):
        return jax.nn.relu(jnp.concatenate([xs, xa, xp], axis=1) @ wfc + bfc)

    def lstm(inp, h_cur, c_cur):
        combined = jnp.concatenate([inp, h_cur], axis=1)
        x = jax.nn.relu(combined @ w1)
        x = jax.nn.relu(x @ w2)
        cc = jax.nn.relu(x @ wgate)
        i = jax.nn.sigmoid(cc[:, 0 * s:1 * s])
        f = jax.nn.sigmoid(cc[:, 1 * s:2 * s])
        o = jax.nn.sigmoid(cc[:, 2 * s:3 * s])
        g = jnp.tanh(cc[:, 3 * s:4 * s])
        c_next = f * c_cur + i * g
        return o * jnp.tanh(c_next), c_next

    hidden = fc(state, act_sequence[:, 0, :], latent)
    cell = fc(state, act_sequence[:, 0, :], latent)
    preds, rewards = [], []
    for t in range(T):
        hidden, cell = lstm(hidden, hidden, cell)
        rewards.append(hidden @ wr + br)
        preds.append(hidden)
        if t < T - 1:
            hidden = fc(hidden, act_sequence[:, t, :], latent)
    return jnp.concatenate(preds, axis=0), jnp.concatenate(rewards, axis=0)


if __name__ == "__main__":
    B, T = 2, 4
    s_dim, a_dim, p_dim = 32, 8, 16

    key = jax.random.PRNGKey(0)
    k_state, k_act, k_lat, k_params = jax.random.split(key, 4)

    state = jax.random.normal(k_state, (B, s_dim), jnp.float32)
    act_sequence = jax.random.normal(k_act, (B, T, a_dim), jnp.float32)
    latent = jax.random.normal(k_lat, (B, p_dim), jnp.float32)

    params = init_params(k_params, s_dim, a_dim, p_dim)
    w_slab, aux_slab = pack_params(params, s_dim, a_dim, p_dim, T)  # one-time pack

    preds, rewards = jax.block_until_ready(
        pred_net_forward(state, act_sequence, latent, w_slab, aux_slab))

    assert preds.shape == (T * B, s_dim), preds.shape
    assert rewards.shape == (T * B, 1), rewards.shape

    preds_ref, rewards_ref = pred_net_reference(state, act_sequence, latent, params)
    # tolerance accounts for bf16 MXU operands (f32 accumulation) across T steps
    assert jnp.allclose(preds, preds_ref, atol=2e-2, rtol=2e-2), "preds mismatch"
    assert jnp.allclose(rewards, rewards_ref, atol=2e-2, rtol=2e-2), "rewards mismatch"

    print("KERNEL_OK")
</pallas_src>

<mosaic_0001>
module attributes {stable_mosaic.version = 11 : i64} {
  func.func @_pred_net_kernel(%arg0: memref<2x128xf32, #tpu.memory_space<vmem>>, %arg1: memref<128x480xbf16, #tpu.memory_space<vmem>>, %arg2: memref<1x128xf32, #tpu.memory_space<vmem>>, %arg3: memref<2x128xf32, #tpu.memory_space<vmem>>, %arg4: memref<2x4xf32, #tpu.memory_space<vmem>>) attributes {dimension_semantics = [], scalar_prefetch = 0 : i64, scratch_operands = 0 : i64, tpu.core_type = #tpu.core_type<tc>} {
    %c0 = arith.constant 0 : index
    %c0_0 = arith.constant 0 : index
    %0 = vector.load %arg1[%c0, %c0_0] : memref<128x480xbf16, #tpu.memory_space<vmem>>, vector<128x480xbf16>
    %1 = vector.extract_strided_slice %0 {offsets = [0, 0], sizes = [128, 192], strides = [1, 1]} : vector<128x480xbf16> to vector<128x192xbf16>
    %2 = vector.extract_strided_slice %0 {offsets = [0, 256], sizes = [32, 224], strides = [1, 1]} : vector<128x480xbf16> to vector<32x224xbf16>
    %3 = vector.extract_strided_slice %2 {offsets = [0, 0], sizes = [32, 32], strides = [1, 1]} : vector<32x224xbf16> to vector<32x32xbf16>
    %4 = vector.extract_strided_slice %2 {offsets = [0, 32], sizes = [32, 32], strides = [1, 1]} : vector<32x224xbf16> to vector<32x32xbf16>
    %5 = vector.extract_strided_slice %2 {offsets = [0, 64], sizes = [32, 32], strides = [1, 1]} : vector<32x224xbf16> to vector<32x32xbf16>
    %6 = vector.extract_strided_slice %2 {offsets = [0, 96], sizes = [32, 128], strides = [1, 1]} : vector<32x224xbf16> to vector<32x128xbf16>
    %c0_1 = arith.constant 0 : index
    %c0_2 = arith.constant 0 : index
    %7 = vector.load %arg2[%c0_1, %c0_2] : memref<1x128xf32, #tpu.memory_space<vmem>>, vector<1x128xf32>
    %8 = vector.extract_strided_slice %7 {offsets = [0, 0], sizes = [1, 32], strides = [1, 1]} : vector<1x128xf32> to vector<1x32xf32>
    %9 = vector.extract_strided_slice %7 {offsets = [0, 32], sizes = [1, 32], strides = [1, 1]} : vector<1x128xf32> to vector<1x32xf32>
    %10 = vector.extract_strided_slice %7 {offsets = [0, 64], sizes = [1, 1], strides = [1, 1]} : vector<1x128xf32> to vector<1x1xf32>
    %c0_3 = arith.constant 0 : index
    %c0_4 = arith.constant 0 : index
    %11 = vector.load %arg0[%c0_3, %c0_4] : memref<2x128xf32, #tpu.memory_space<vmem>>, vector<2x128xf32>
    %12 = arith.truncf %11 : vector<2x128xf32> to vector<2x128xbf16>
    %cst = arith.constant dense<0.000000e+00> : vector<2x192xf32>
    %13 = tpu.matmul %12, %1, %cst {dimension_numbers = #tpu.dot_dimension_numbers<[1], [0], [0], [1], [0, 0, 1, 1], [], []>} : vector<2x128xbf16>, vector<128x192xbf16>, vector<2x192xf32> -> vector<2x192xf32>
    %14 = vector.extract_strided_slice %13 {offsets = [0, 0], sizes = [2, 32], strides = [1, 1]} : vector<2x192xf32> to vector<2x32xf32>
    %15 = vector.extract_strided_slice %13 {offsets = [0, 160], sizes = [2, 32], strides = [1, 1]} : vector<2x192xf32> to vector<2x32xf32>
    %16 = vector.broadcast %8 : vector<1x32xf32> to vector<2x32xf32>
    %17 = arith.addf %15, %16 : vector<2x32xf32>
    %18 = vector.extract_strided_slice %13 {offsets = [0, 32], sizes = [2, 32], strides = [1, 1]} : vector<2x192xf32> to vector<2x32xf32>
    %19 = arith.addf %14, %18 : vector<2x32xf32>
    %20 = arith.addf %19, %17 : vector<2x32xf32>
    %cst_5 = arith.constant 0.000000e+00 : f32
    %21 = vector.broadcast %cst_5 : f32 to vector<2x32xf32>
    %22 = arith.maximumf %20, %21 : vector<2x32xf32>
    %23 = arith.truncf %22 : vector<2x32xf32> to vector<2x32xbf16>
    %cst_6 = arith.constant dense<0.000000e+00> : vector<2x32xf32>
    %24 = tpu.matmul %23, %4, %cst_6 {dimension_numbers = #tpu.dot_dimension_numbers<[1], [0], [0], [1], [0, 0, 1, 1], [], []>} : vector<2x32xbf16>, vector<32x32xbf16>, vector<2x32xf32> -> vector<2x32xf32>
    %cst_7 = arith.constant 0.000000e+00 : f32
    %25 = vector.broadcast %cst_7 : f32 to vector<2x32xf32>
    %26 = arith.maximumf %24, %25 : vector<2x32xf32>
    %27 = arith.truncf %26 : vector<2x32xf32> to vector<2x32xbf16>
    %cst_8 = arith.constant dense<0.000000e+00> : vector<2x32xf32>
    %28 = tpu.matmul %27, %5, %cst_8 {dimension_numbers = #tpu.dot_dimension_numbers<[1], [0], [0], [1], [0, 0, 1, 1], [], []>} : vector<2x32xbf16>, vector<32x32xbf16>, vector<2x32xf32> -> vector<2x32xf32>
    %cst_9 = arith.constant 0.000000e+00 : f32
    %29 = vector.broadcast %cst_9 : f32 to vector<2x32xf32>
    %30 = arith.maximumf %28, %29 : vector<2x32xf32>
    %31 = arith.truncf %30 : vector<2x32xf32> to vector<2x32xbf16>
    %cst_10 = arith.constant dense<0.000000e+00> : vector<2x128xf32>
    %32 = tpu.matmul %31, %6, %cst_10 {dimension_numbers = #tpu.dot_dimension_numbers<[1], [0], [0], [1], [0, 0, 1, 1], [], []>} : vector<2x32xbf16>, vector<32x128xbf16>, vector<2x128xf32> -> vector<2x128xf32>
    %cst_11 = arith.constant 0.000000e+00 : f32
    %33 = vector.broadcast %cst_11 : f32 to vector<2x128xf32>
    %34 = arith.maximumf %32, %33 : vector<2x128xf32>
    %35 = arith.negf %34 : vector<2x128xf32>
    %36 = math.exp %35 : vector<2x128xf32>
    %cst_12 = arith.constant 1.000000e+00 : f32
    %37 = vector.broadcast %cst_12 : f32 to vector<2x128xf32>
    %38 = arith.addf %37, %36 : vector<2x128xf32>
    %39 = arith.divf %37, %38 : vector<2x128xf32>
    %40 = vector.extract_strided_slice %39 {offsets = [0, 0], sizes = [2, 32], strides = [1, 1]} : vector<2x128xf32> to vector<2x32xf32>
    %41 = vector.extract_strided_slice %39 {offsets = [0, 32], sizes = [2, 32], strides = [1, 1]} : vector<2x128xf32> to vector<2x32xf32>
    %42 = vector.extract_strided_slice %39 {offsets = [0, 64], sizes = [2, 32], strides = [1, 1]} : vector<2x128xf32> to vector<2x32xf32>
    %43 = vector.extract_strided_slice %34 {offsets = [0, 96], sizes = [2, 32], strides = [1, 1]} : vector<2x128xf32> to vector<2x32xf32>
    %44 = math.tanh %43 : vector<2x32xf32>
    %45 = arith.mulf %41, %22 : vector<2x32xf32>
    %46 = arith.mulf %40, %44 : vector<2x32xf32>
    %47 = arith.addf %45, %46 : vector<2x32xf32>
    %48 = math.tanh %47 : vector<2x32xf32>
    %49 = arith.mulf %42, %48 : vector<2x32xf32>
    %50 = vector.broadcast %9 : vector<1x32xf32> to vector<2x32xf32>
    %51 = arith.mulf %49, %50 : vector<2x32xf32>
    %cst_13 = arith.constant dense<0.000000e+00> : vector<2xf32>
    %52 = vector.multi_reduction <add>, %51, %cst_13 [1] : vector<2x32xf32> to vector<2xf32>
    %53 = vector.shape_cast %52 : vector<2xf32> to vector<2x1xf32>
    %54 = vector.broadcast %10 : vector<1x1xf32> to vector<2x1xf32>
    %55 = arith.addf %53, %54 : vector<2x1xf32>
    %56 = arith.truncf %49 : vector<2x32xf32> to vector<2x32xbf16>
    %cst_14 = arith.constant dense<0.000000e+00> : vector<2x32xf32>
    %57 = tpu.matmul %56, %3, %cst_14 {dimension_numbers = #tpu.dot_dimension_numbers<[1], [0], [0], [1], [0, 0, 1, 1], [], []>} : vector<2x32xbf16>, vector<32x32xbf16>, vector<2x32xf32> -> vector<2x32xf32>
    %58 = vector.extract_strided_slice %13 {offsets = [0, 32], sizes = [2, 32], strides = [1, 1]} : vector<2x192xf32> to vector<2x32xf32>
    %59 = arith.addf %57, %58 : vector<2x32xf32>
    %60 = arith.addf %59, %17 : vector<2x32xf32>
    %cst_15 = arith.constant 0.000000e+00 : f32
    %61 = vector.broadcast %cst_15 : f32 to vector<2x32xf32>
    %62 = arith.maximumf %60, %61 : vector<2x32xf32>
    %63 = arith.truncf %62 : vector<2x32xf32> to vector<2x32xbf16>
    %cst_16 = arith.constant dense<0.000000e+00> : vector<2x32xf32>
    %64 = tpu.matmul %63, %4, %cst_16 {dimension_numbers = #tpu.dot_dimension_numbers<[1], [0], [0], [1], [0, 0, 1, 1], [], []>} : vector<2x32xbf16>, vector<32x32xbf16>, vector<2x32xf32> -> vector<2x32xf32>
    %cst_17 = arith.constant 0.000000e+00 : f32
    %65 = vector.broadcast %cst_17 : f32 to vector<2x32xf32>
    %66 = arith.maximumf %64, %65 : vector<2x32xf32>
    %67 = arith.truncf %66 : vector<2x32xf32> to vector<2x32xbf16>
    %cst_18 = arith.constant dense<0.000000e+00> : vector<2x32xf32>
    %68 = tpu.matmul %67, %5, %cst_18 {dimension_numbers = #tpu.dot_dimension_numbers<[1], [0], [0], [1], [0, 0, 1, 1], [], []>} : vector<2x32xbf16>, vector<32x32xbf16>, vector<2x32xf32> -> vector<2x32xf32>
    %cst_19 = arith.constant 0.000000e+00 : f32
    %69 = vector.broadcast %cst_19 : f32 to vector<2x32xf32>
    %70 = arith.maximumf %68, %69 : vector<2x32xf32>
    %71 = arith.truncf %70 : vector<2x32xf32> to vector<2x32xbf16>
    %cst_20 = arith.constant dense<0.000000e+00> : vector<2x128xf32>
    %72 = tpu.matmul %71, %6, %cst_20 {dimension_numbers = #tpu.dot_dimension_numbers<[1], [0], [0], [1], [0, 0, 1, 1], [], []>} : vector<2x32xbf16>, vector<32x128xbf16>, vector<2x128xf32> -> vector<2x128xf32>
    %cst_21 = arith.constant 0.000000e+00 : f32
    %73 = vector.broadcast %cst_21 : f32 to vector<2x128xf32>
    %74 = arith.maximumf %72, %73 : vector<2x128xf32>
    %75 = arith.negf %74 : vector<2x128xf32>
    %76 = math.exp %75 : vector<2x128xf32>
    %cst_22 = arith.constant 1.000000e+00 : f32
    %77 = vector.broadcast %cst_22 : f32 to vector<2x128xf32>
    %78 = arith.addf %77, %76 : vector<2x128xf32>
    %79 = arith.divf %77, %78 : vector<2x128xf32>
    %80 = vector.extract_strided_slice %79 {offsets = [0, 0], sizes = [2, 32], strides = [1, 1]} : vector<2x128xf32> to vector<2x32xf32>
    %81 = vector.extract_strided_slice %79 {offsets = [0, 32], sizes = [2, 32], strides = [1, 1]} : vector<2x128xf32> to vector<2x32xf32>
    %82 = vector.extract_strided_slice %79 {offsets = [0, 64], sizes = [2, 32], strides = [1, 1]} : vector<2x128xf32> to vector<2x32xf32>
    %83 = vector.extract_strided_slice %74 {offsets = [0, 96], sizes = [2, 32], strides = [1, 1]} : vector<2x128xf32> to vector<2x32xf32>
    %84 = math.tanh %83 : vector<2x32xf32>
    %85 = arith.mulf %81, %47 : vector<2x32xf32>
    %86 = arith.mulf %80, %84 : vector<2x32xf32>
    %87 = arith.addf %85, %86 : vector<2x32xf32>
    %88 = math.tanh %87 : vector<2x32xf32>
    %89 = arith.mulf %82, %88 : vector<2x32xf32>
    %90 = vector.broadcast %9 : vector<1x32xf32> to vector<2x32xf32>
    %91 = arith.mulf %89, %90 : vector<2x32xf32>
    %cst_23 = arith.constant dense<0.000000e+00> : vector<2xf32>
    %92 = vector.multi_reduction <add>, %91, %cst_23 [1] : vector<2x32xf32> to vector<2xf32>
    %93 = vector.shape_cast %92 : vector<2xf32> to vector<2x1xf32>
    %94 = vector.broadcast %10 : vector<1x1xf32> to vector<2x1xf32>
    %95 = arith.addf %93, %94 : vector<2x1xf32>
    %96 = arith.truncf %89 : vector<2x32xf32> to vector<2x32xbf16>
    %cst_24 = arith.constant dense<0.000000e+00> : vector<2x32xf32>
    %97 = tpu.matmul %96, %3, %cst_24 {dimension_numbers = #tpu.dot_dimension_numbers<[1], [0], [0], [1], [0, 0, 1, 1], [], []>} : vector<2x32xbf16>, vector<32x32xbf16>, vector<2x32xf32> -> vector<2x32xf32>
    %98 = vector.extract_strided_slice %13 {offsets = [0, 64], sizes = [2, 32], strides = [1, 1]} : vector<2x192xf32> to vector<2x32xf32>
    %99 = arith.addf %97, %98 : vector<2x32xf32>
    %100 = arith.addf %99, %17 : vector<2x32xf32>
    %cst_25 = arith.constant 0.000000e+00 : f32
    %101 = vector.broadcast %cst_25 : f32 to vector<2x32xf32>
    %102 = arith.maximumf %100, %101 : vector<2x32xf32>
    %103 = arith.truncf %102 : vector<2x32xf32> to vector<2x32xbf16>
    %cst_26 = arith.constant dense<0.000000e+00> : vector<2x32xf32>
    %104 = tpu.matmul %103, %4, %cst_26 {dimension_numbers = #tpu.dot_dimension_numbers<[1], [0], [0], [1], [0, 0, 1, 1], [], []>} : vector<2x32xbf16>, vector<32x32xbf16>, vector<2x32xf32> -> vector<2x32xf32>
    %cst_27 = arith.constant 0.000000e+00 : f32
    %105 = vector.broadcast %cst_27 : f32 to vector<2x32xf32>
    %106 = arith.maximumf %104, %105 : vector<2x32xf32>
    %107 = arith.truncf %106 : vector<2x32xf32> to vector<2x32xbf16>
    %cst_28 = arith.constant dense<0.000000e+00> : vector<2x32xf32>
    %108 = tpu.matmul %107, %5, %cst_28 {dimension_numbers = #tpu.dot_dimension_numbers<[1], [0], [0], [1], [0, 0, 1, 1], [], []>} : vector<2x32xbf16>, vector<32x32xbf16>, vector<2x32xf32> -> vector<2x32xf32>
    %cst_29 = arith.constant 0.000000e+00 : f32
    %109 = vector.broadcast %cst_29 : f32 to vector<2x32xf32>
    %110 = arith.maximumf %108, %109 : vector<2x32xf32>
    %111 = arith.truncf %110 : vector<2x32xf32> to vector<2x32xbf16>
    %cst_30 = arith.constant dense<0.000000e+00> : vector<2x128xf32>
    %112 = tpu.matmul %111, %6, %cst_30 {dimension_numbers = #tpu.dot_dimension_numbers<[1], [0], [0], [1], [0, 0, 1, 1], [], []>} : vector<2x32xbf16>, vector<32x128xbf16>, vector<2x128xf32> -> vector<2x128xf32>
    %cst_31 = arith.constant 0.000000e+00 : f32
    %113 = vector.broadcast %cst_31 : f32 to vector<2x128xf32>
    %114 = arith.maximumf %112, %113 : vector<2x128xf32>
    %115 = arith.negf %114 : vector<2x128xf32>
    %116 = math.exp %115 : vector<2x128xf32>
    %cst_32 = arith.constant 1.000000e+00 : f32
    %117 = vector.broadcast %cst_32 : f32 to vector<2x128xf32>
    %118 = arith.addf %117, %116 : vector<2x128xf32>
    %119 = arith.divf %117, %118 : vector<2x128xf32>
    %120 = vector.extract_strided_slice %119 {offsets = [0, 0], sizes = [2, 32], strides = [1, 1]} : vector<2x128xf32> to vector<2x32xf32>
    %121 = vector.extract_strided_slice %119 {offsets = [0, 32], sizes = [2, 32], strides = [1, 1]} : vector<2x128xf32> to vector<2x32xf32>
    %122 = vector.extract_strided_slice %119 {offsets = [0, 64], sizes = [2, 32], strides = [1, 1]} : vector<2x128xf32> to vector<2x32xf32>
    %123 = vector.extract_strided_slice %114 {offsets = [0, 96], sizes = [2, 32], strides = [1, 1]} : vector<2x128xf32> to vector<2x32xf32>
    %124 = math.tanh %123 : vector<2x32xf32>
    %125 = arith.mulf %121, %87 : vector<2x32xf32>
    %126 = arith.mulf %120, %124 : vector<2x32xf32>
    %127 = arith.addf %125, %126 : vector<2x32xf32>
    %128 = math.tanh %127 : vector<2x32xf32>
    %129 = arith.mulf %122, %128 : vector<2x32xf32>
    %130 = vector.broadcast %9 : vector<1x32xf32> to vector<2x32xf32>
    %131 = arith.mulf %129, %130 : vector<2x32xf32>
    %cst_33 = arith.constant dense<0.000000e+00> : vector<2xf32>
    %132 = vector.multi_reduction <add>, %131, %cst_33 [1] : vector<2x32xf32> to vector<2xf32>
    %133 = vector.shape_cast %132 : vector<2xf32> to vector<2x1xf32>
    %134 = vector.broadcast %10 : vector<1x1xf32> to vector<2x1xf32>
    %135 = arith.addf %133, %134 : vector<2x1xf32>
    %136 = arith.truncf %129 : vector<2x32xf32> to vector<2x32xbf16>
    %cst_34 = arith.constant dense<0.000000e+00> : vector<2x32xf32>
    %137 = tpu.matmul %136, %3, %cst_34 {dimension_numbers = #tpu.dot_dimension_numbers<[1], [0], [0], [1], [0, 0, 1, 1], [], []>} : vector<2x32xbf16>, vector<32x32xbf16>, vector<2x32xf32> -> vector<2x32xf32>
    %138 = vector.extract_strided_slice %13 {offsets = [0, 96], sizes = [2, 32], strides = [1, 1]} : vector<2x192xf32> to vector<2x32xf32>
    %139 = arith.addf %137, %138 : vector<2x32xf32>
    %140 = arith.addf %139, %17 : vector<2x32xf32>
    %cst_35 = arith.constant 0.000000e+00 : f32
    %141 = vector.broadcast %cst_35 : f32 to vector<2x32xf32>
    %142 = arith.maximumf %140, %141 : vector<2x32xf32>
    %143 = arith.truncf %142 : vector<2x32xf32> to vector<2x32xbf16>
    %cst_36 = arith.constant dense<0.000000e+00> : vector<2x32xf32>
    %144 = tpu.matmul %143, %4, %cst_36 {dimension_numbers = #tpu.dot_dimension_numbers<[1], [0], [0], [1], [0, 0, 1, 1], [], []>} : vector<2x32xbf16>, vector<32x32xbf16>, vector<2x32xf32> -> vector<2x32xf32>
    %cst_37 = arith.constant 0.000000e+00 : f32
    %145 = vector.broadcast %cst_37 : f32 to vector<2x32xf32>
    %146 = arith.maximumf %144, %145 : vector<2x32xf32>
    %147 = arith.truncf %146 : vector<2x32xf32> to vector<2x32xbf16>
    %cst_38 = arith.constant dense<0.000000e+00> : vector<2x32xf32>
    %148 = tpu.matmul %147, %5, %cst_38 {dimension_numbers = #tpu.dot_dimension_numbers<[1], [0], [0], [1], [0, 0, 1, 1], [], []>} : vector<2x32xbf16>, vector<32x32xbf16>, vector<2x32xf32> -> vector<2x32xf32>
    %cst_39 = arith.constant 0.000000e+00 : f32
    %149 = vector.broadcast %cst_39 : f32 to vector<2x32xf32>
    %150 = arith.maximumf %148, %149 : vector<2x32xf32>
    %151 = arith.truncf %150 : vector<2x32xf32> to vector<2x32xbf16>
    %cst_40 = arith.constant dense<0.000000e+00> : vector<2x128xf32>
    %152 = tpu.matmul %151, %6, %cst_40 {dimension_numbers = #tpu.dot_dimension_numbers<[1], [0], [0], [1], [0, 0, 1, 1], [], []>} : vector<2x32xbf16>, vector<32x128xbf16>, vector<2x128xf32> -> vector<2x128xf32>
    %cst_41 = arith.constant 0.000000e+00 : f32
    %153 = vector.broadcast %cst_41 : f32 to vector<2x128xf32>
    %154 = arith.maximumf %152, %153 : vector<2x128xf32>
    %155 = arith.negf %154 : vector<2x128xf32>
    %156 = math.exp %155 : vector<2x128xf32>
    %cst_42 = arith.constant 1.000000e+00 : f32
    %157 = vector.broadcast %cst_42 : f32 to vector<2x128xf32>
    %158 = arith.addf %157, %156 : vector<2x128xf32>
    %159 = arith.divf %157, %158 : vector<2x128xf32>
    %160 = vector.extract_strided_slice %159 {offsets = [0, 0], sizes = [2, 32], strides = [1, 1]} : vector<2x128xf32> to vector<2x32xf32>
    %161 = vector.extract_strided_slice %159 {offsets = [0, 32], sizes = [2, 32], strides = [1, 1]} : vector<2x128xf32> to vector<2x32xf32>
    %162 = vector.extract_strided_slice %159 {offsets = [0, 64], sizes = [2, 32], strides = [1, 1]} : vector<2x128xf32> to vector<2x32xf32>
    %163 = vector.extract_strided_slice %154 {offsets = [0, 96], sizes = [2, 32], strides = [1, 1]} : vector<2x128xf32> to vector<2x32xf32>
    %164 = math.tanh %163 : vector<2x32xf32>
    %165 = arith.mulf %161, %127 : vector<2x32xf32>
    %166 = arith.mulf %160, %164 : vector<2x32xf32>
    %167 = arith.addf %165, %166 : vector<2x32xf32>
    %168 = math.tanh %167 : vector<2x32xf32>
    %169 = arith.mulf %162, %168 : vector<2x32xf32>
    %170 = vector.broadcast %9 : vector<1x32xf32> to vector<2x32xf32>
    %171 = arith.mulf %169, %170 : vector<2x32xf32>
    %cst_43 = arith.constant dense<0.000000e+00> : vector<2xf32>
    %172 = vector.multi_reduction <add>, %171, %cst_43 [1] : vector<2x32xf32> to vector<2xf32>
    %173 = vector.shape_cast %172 : vector<2xf32> to vector<2x1xf32>
    %174 = vector.broadcast %10 : vector<1x1xf32> to vector<2x1xf32>
    %175 = arith.addf %173, %174 : vector<2x1xf32>
    %176 = tpu.concatenate %49, %89, %129, %169 in 1 : vector<2x32xf32>, vector<2x32xf32>, vector<2x32xf32>, vector<2x32xf32> -> vector<2x128xf32>
    %c0_44 = arith.constant 0 : index
    %c0_45 = arith.constant 0 : index
    %177 = vector.load %arg3[%c0_44, %c0_45] : memref<2x128xf32, #tpu.memory_space<vmem>>, vector<2x128xf32>
    tpu.vector_store %arg3[%c0_44, %c0_45], %176 {strides = array<i32>} : memref<2x128xf32, #tpu.memory_space<vmem>>, vector<2x128xf32>,
    %178 = tpu.concatenate %55, %95, %135, %175 in 1 : vector<2x1xf32>, vector<2x1xf32>, vector<2x1xf32>, vector<2x1xf32> -> vector<2x4xf32>
    %c0_46 = arith.constant 0 : index
    %c0_47 = arith.constant 0 : index
    %179 = vector.load %arg4[%c0_46, %c0_47] : memref<2x4xf32, #tpu.memory_space<vmem>>, vector<2x4xf32>
    tpu.vector_store %arg4[%c0_46, %c0_47], %178 {strides = array<i32>} : memref<2x4xf32, #tpu.memory_space<vmem>>, vector<2x4xf32>,
    return
  }
}

</mosaic_0001>

<bundles_post_ra>
// kernel: pred_net_forward.1
= control target key start
LH: loop header
LB: loop body
LE: loop exit
PB: predicated region body
PF: predicated region fallthrough
CT: control target
= control target key end

     0   :  { %v1382_v1 = vmov 0   ;;  %s1383_s9 = smov 32   ;;  %s1384_s27 = smov 96   ;;  %v1385_v21 = vmov 0.0   ;;  %vm1386_vm0 = vmmov 0   ;;  %vm198_vm1 = vcmask 261120   ;;  %s1719_s1 = inlined_call_operand.vmem [shape: bf16[128,480], index: 1, kind: input, shape index: {}]   ;;  %s1720_s2 = inlined_call_operand.vmem [shape: f32[1,128], index: 2, kind: input, shape index: {}]   ;;  %s1721_s0 = inlined_call_operand.vmem [shape: f32[2,128], index: 0, kind: input, shape index: {}]   ;;  %s1722_s3 = inlined_call_operand.vmem [shape: f32[2,128], index: 3, kind: output, shape index: {0}]   ;;  %s1723_s4 = inlined_call_operand.vmem [shape: f32[2,4], index: 4, kind: output, shape index: {1}]  }
   0x1   :  { %v1320_v0 = vld [vmem:[%s1719_s1 + $0xe4] ss:$16 sps:$4 sm:$0xff]   ;;  %152 = vmatprep.mubr.bf16.mxu0 %v1382_v1  ;;  %v1322_v2 = vld [vmem:[%s1719_s1 + $0xe0] ss:$16 sps:$4 sm:$0xff]   ;;  %v1477_v20 = vld [vmem:[%s1719_s1 + $0x28] ss:$16 sps:$4 sm:$0xff]   ;;  %1191 = vmatprep.subr.bf16.mxu1 %v1385_v21 }
   0x2   :  { %120 = vmatprep.subr.bf16.mxu0 %v1320_v0  ;;  %v1323_v3 = vld [vmem:[%s1719_s1 + $0xc4] ss:$16 sps:$4 sm:$0xff]   ;;  %v1325_v4 = vld [vmem:[%s1719_s1 + $0xc0] ss:$16 sps:$4 sm:$0xff]   ;;  %194 = vrot.lane.b32.xlu1 %v1477_v20, %s1384_s27  ;;  %v1502_v25 = vld [vmem:[%s1719_s1 + $0x8] ss:$16 sps:$4 sm:$0xff]  }
   0x3   :  { %121 = vmatpush1.bf16.msra.mxu0 %v1322_v2  ;;  %v1326_v5 = vld [vmem:[%s1719_s1 + $0xa4] ss:$16 sps:$4 sm:$0xff]   ;;  %v1328_v6 = vld [vmem:[%s1719_s1 + $0xa0] ss:$16 sps:$4 sm:$0xff]   ;;  %1195 = vmatprep.mubr.msk.bf16.mxu1 %vm1386_vm0, %v1385_v21  ;;  %s1387_s29 = smov 64   ;;  %vm391_vm2 = vcmask 254976  }
   0x4   :  { %122 = vmatprep.subr.bf16.mxu0 %v1323_v3  ;;  %v1329_v7 = vld [vmem:[%s1719_s1 + $0x84] ss:$16 sps:$4 sm:$0xff]   ;;  %v1331_v8 = vld [vmem:[%s1719_s1 + $0x80] ss:$16 sps:$4 sm:$0xff]   ;;  %v1348_v30 = vld [vmem:[%s1719_s1 + $0x2c] ss:$16 sps:$4 sm:$0xff]  }
   0x5   :  { %v1443_v9 = vld [vmem:[%s1720_s2] ss:$0 sm:$0xff]  ;;  %v1332_v10 = vld [vmem:[%s1719_s1 + $0x64] ss:$16 sps:$4 sm:$0xff]   ;;  %v1349_v31 = vld [vmem:[%s1719_s1 + $0xc] ss:$16 sps:$4 sm:$0xff]  }
   0x6   :  { %166 = vrot.lane.b32.xlu0 %v1443_v9, %s1383_s9  ;;  %v1334_v11 = vld [vmem:[%s1719_s1 + $0x60] ss:$16 sps:$4 sm:$0xff]   ;;  %v1335_v12 = vld [vmem:[%s1719_s1 + $0x44] ss:$16 sps:$4 sm:$0xff]   ;;  %s1389_s8 = smov 66   ;;  %s1390_s10 = smov 67  }
   0x7   :  { %123 = vmatpush1.bf16.msra.mxu0 %v1325_v4  ;;  %v1337_v13 = vld [vmem:[%s1719_s1 + $0x40] ss:$16 sps:$4 sm:$0xff]   ;;  %v1338_v14 = vld [vmem:[%s1719_s1 + $0x24] ss:$16 sps:$4 sm:$0xff]   ;;  %vm1069_vm3 = vcmask 523264   ;;  %vm1071_vm4 = vcmask 785408  }
   0x8   :  { %124 = vmatprep.subr.bf16.mxu0 %v1326_v5  ;;  %v1340_v15 = vld [vmem:[%s1719_s1 + $0x20] ss:$16 sps:$4 sm:$0xff]   ;;  %v1341_v16 = vld [vmem:[%s1719_s1 + $0x4] ss:$16 sps:$4 sm:$0xff]   ;;  %vm1090_vm5 = vcmask 7168   ;;  %vm1092_vm6 = vcmask 15360  }
   0x9   :  { %v1343_v17 = vld [vmem:[%s1719_s1] ss:$16 sps:$4 sm:$0xff]   ;;  %s1388_s1 = smov 65   ;;  %vm1094_vm7 = vcmask 23552   ;;  %vm1096_vm8 = vcmask 25600  }
   0xa   :  { %v38_v18 = vld [vmem:[%s1721_s0] sm:$0x3] }
   0xb   :  { %125 = vmatpush1.bf16.msra.mxu0 %v1328_v6  ;;  %v39_v19 = vpack.c.bf16 %v38_v18, %v38_v18 }
   0xc   :  { %126 = vmatprep.subr.bf16.mxu0 %v1329_v7 }
   0xf   :  { %127 = vmatpush1.bf16.msra.mxu0 %v1331_v8 }
  0x10   :  { %128 = vmatprep.subr.bf16.mxu0 %v1332_v10 }
  0x13   :  { %129 = vmatpush1.bf16.msra.mxu0 %v1334_v11 }
  0x14   :  { %130 = vmatprep.subr.bf16.mxu0 %v1335_v12 }
  0x17   :  { %131 = vmatpush1.bf16.msra.mxu0 %v1337_v13 }
  0x18   :  { %132 = vmatprep.subr.bf16.mxu0 %v1338_v14 }
  0x1b   :  { %133 = vmatpush1.bf16.msra.mxu0 %v1340_v15 }
  0x1c   :  { %134 = vmatprep.subr.bf16.mxu0 %v1341_v16 }
  0x1f   :  { %135 = vmatpush1.bf16.msra.mxu0 %v1343_v17 }
  0x20   :  { %1223 = vmatprep.subr.bf16.mxu0 %v1385_v21 }
  0x22   :  { %153 = vmatmul.mubr.bf16.vlgmr.msra.gmra.mxu0 %v39_v19 }
  0x23   :  { %1227 = vmatprep.mubr.msk.bf16.mxu0 %vm1386_vm0, %v1385_v21 }
  0x74   :  { %v1483_v22 = vpop.permute.xlu1 %194 }
  0x75   :  { %1192 = vmatpush3.bf16.msra.mxu1 %v1483_v22  ;;  %1224 = vmatpush3.bf16.msra.mxu0 %v1483_v22 }
  0x76   :  { %1193 = vmatprep.subr.bf16.mxu1 %v1385_v21  ;;  %1225 = vmatprep.subr.bf16.mxu0 %v1385_v21 }
  0x78   :  { %v1495_v24 = vpop.permute.xlu0 %166 }
  0xe2   :  { %v1493_v23 = vpop.f32.mrf.mxu0 }
  0xe3   :  { %171 = vrot.lane.b32.xlu0 %v1493_v23, %s1384_s27 }
  0xe4   :  { %v156_v26 = vpop.f32.mrf.mxu0 }
  0xe5   :  { %v169_v27 = vadd.f32 %v1495_v24, %v156_v26 }
  0xe6   :  { %v158_v28 = vpop.f32.mrf.mxu0 }
  0xe7   :  { %176 = vrot.lane.b32.xlu1 %v169_v27, %s1384_s27  ;;  %192 = vrot.lane.b32.xlu0 %v1502_v25, %s1384_s27 }
  0xe8   :  { %v159_v29 = vpop.f32.mrf.mxu0 }
  0xeb   :  { %244 = vrot.lane.b32.xlu0 %v1502_v25, %s1387_s29  ;;  %246 = vrot.lane.b32.xlu1 %v1477_v20, %s1387_s29 }
  0xef   :  { %307 = vrot.lane.b32.xlu0 %v1348_v30, %s1383_s9  ;;  %305 = vrot.lane.b32.xlu1 %v1477_v20, %s1383_s9 }
  0xf3   :  { %303 = vrot.lane.b32.xlu0 %v1349_v31, %s1383_s9  ;;  %301 = vrot.lane.b32.xlu1 %v1502_v25, %s1383_s9 }
 0x155   :  { %v1524_v32 = vpop.permute.xlu0 %171 }
 0x156   :  { %v174_v33 = vadd.f32 %v1524_v32, %v1493_v23 }
 0x159   :  { %v1528_v34 = vpop.permute.xlu1 %176  ;;  %v1530_v35 = vpop.permute.xlu0 %192 }
 0x15a   :  { %1194 = vmatpush3.bf16.msra.mxu1 %v1530_v35  ;;  %1226 = vmatpush3.bf16.msra.mxu0 %v1530_v35  ;;  %v179_v36 = vadd.f32 %v1528_v34, %v174_v33 }
 0x15b   :  { %1199 = vmatprep.subr.bf16.mxu1 %v1385_v21  ;;  %1239 = vmatprep.subr.bf16.mxu0 %v1385_v21 }
 0x15c   :  { %v180_v37 = vmax.f32 %v179_v36, 0.0 }
 0x15d   :  { %v1538_v39 = vpop.permute.xlu1 %246  ;;  %v1545_v40 = vpop.permute.xlu0 %244 }
 0x15e   :  { %366 = vrot.lane.b32.xlu0 %v180_v37, %s1383_s9  ;;  %v181_v38 = vpack.c.bf16 %v180_v37, %v180_v37 }
 0x160   :  { %1196 = vmatmul.mubr.msk.bf16.vlgmr.msra.gmra.mxu1 %vm198_vm1, %v181_v38 }
 0x161   :  { %1200 = vmatpush3.bf16.msra.mxu1 %v1538_v39  ;;  %1203 = vmatprep.mubr.msk.bf16.mxu1 %vm1386_vm0, %v1385_v21  ;;  %v306_v41 = vpop.permute.xlu1 %305  ;;  %v308_v42 = vpop.permute.xlu0 %307 }
 0x162   :  { %1201 = vmatprep.subr.bf16.mxu1 %v1385_v21  ;;  %v1550_v47 = vsel %vm198_vm1, %v306_v41, %v308_v42 }
 0x165   :  { %1202 = vmatpush3.bf16.msra.mxu1 %v1545_v40  ;;  %v302_v49 = vpop.permute.xlu1 %301  ;;  %v304_v50 = vpop.permute.xlu0 %303 }
 0x166   :  { %1207 = vmatprep.subr.bf16.mxu1 %v1385_v21  ;;  %v1557_v52 = vsel %vm198_vm1, %v302_v49, %v304_v50 }
 0x1d0   :  { %v367_v7 = vpop.permute.xlu0 %366 }
 0x220   :  { %v236_v43 = vpop.f32.mrf.mxu1 }
 0x221   :  { %v242_v44 = vmax.f32 %v236_v43, 0.0 }
 0x222   :  { %v1197_v45 = vpop.f32.mrf.mxu1 }
 0x223   :  { %v243_v46 = vpack.c.bf16 %v242_v44, %v242_v44 }
 0x224   :  { %v239_v48 = vpop.f32.mrf.mxu1 }
 0x225   :  { %1204 = vmatmul.mubr.msk.bf16.vlgmr.msra.gmra.mxu1 %vm198_vm1, %v243_v46 }
 0x226   :  { %v1198_v51 = vpop.f32.mrf.mxu1  ;;  %1208 = vmatpush3.bf16.msra.mxu1 %v1550_v47  ;;  %1211 = vmatprep.mubr.msk.bf16.mxu1 %vm1386_vm0, %v1385_v21 }
 0x227   :  { %1209 = vmatprep.subr.bf16.mxu1 %v1385_v21 }
 0x22a   :  { %1210 = vmatpush3.bf16.msra.mxu1 %v1557_v52 }
 0x22b   :  { %1215 = vmatprep.subr.bf16.mxu1 %v1385_v21 }
 0x2e5   :  { %v287_v53 = vpop.f32.mrf.mxu1 }
 0x2e6   :  { %v293_v54 = vmax.f32 %v287_v53, 0.0 }
 0x2e7   :  { %v1205_v55 = vpop.f32.mrf.mxu1 }
 0x2e8   :  { %v294_v56 = vpack.c.bf16 %v293_v54, %v293_v54 }
 0x2e9   :  { %v290_v57 = vpop.f32.mrf.mxu1 }
 0x2ea   :  { %1212 = vmatmul.mubr.msk.bf16.vlgmr.msra.gmra.mxu1 %vm198_vm1, %v294_v56 }
 0x2eb   :  { %v1206_v58 = vpop.f32.mrf.mxu1  ;;  %1216 = vmatpush3.bf16.msra.mxu1 %v1477_v20  ;;  %1219 = vmatprep.mubr.msk.bf16.mxu1 %vm1386_vm0, %v1385_v21 }
 0x2ec   :  { %1217 = vmatprep.subr.bf16.mxu1 %v1385_v21 }
 0x2ef   :  { %1218 = vmatpush3.bf16.msra.mxu1 %v1502_v25 }
 0x2f0   :  { %1231 = vmatprep.subr.bf16.mxu1 %v1385_v21 }
 0x3aa   :  { %v351_v59 = vpop.f32.mrf.mxu1 }
 0x3ab   :  { %v357_v60 = vmax.f32 %v351_v59, 0.0 }
 0x3ac   :  { %v1213_v61 = vpop.f32.mrf.mxu1 }
 0x3ad   :  { %1350 = vtanh.f32 %v357_v60  ;;  %v1130_v1 = vmul.f32 -1.442695, %v357_v60 }
 0x3ae   :  { %v354_v62 = vpop.f32.mrf.mxu1 }
 0x3af   :  { %1352 = vpow2.f32 %v1130_v1 }
 0x3b0   :  { %v1214_v63 = vpop.f32.mrf.mxu1 }
 0x3ba   :  { %v1351_v0 = vpop.eup %1350 }
 0x3bb   :  { %371 = vrot.lane.b32.xlu1 %v1351_v0, %s1383_s9 }
 0x3bc   :  { %v1353_v2 = vpop.eup %1352 }
 0x3bd   :  { %v361_v3 = vadd.f32 1.0, %v1353_v2 }
 0x3bf   :  { %1354 = vrcp.f32 %v361_v3 }
 0x3cc   :  { %v1355_v4 = vpop.eup %1354 }
 0x3cd   :  { %v369_v8 = vmul.f32 %v1355_v4, %v367_v7 }
 0x42d   :  { %v372_v5 = vpop.permute.xlu1 %371 }
 0x42e   :  { %v374_v6 = vmul.f32 %v1355_v4, %v372_v5 }
 0x430   :  { %376 = vrot.lane.b32.xlu1 %v374_v6, %s1383_s9 }
 0x4a2   :  { %v377_v10 = vpop.permute.xlu1 %376 }
 0x4a3   :  { %v1571_v11 = vadd.f32 %v377_v10, %v369_v8 }
 0x4a5   :  { %1356 = vtanh.f32 %v1571_v11 }
 0x4b2   :  { %v1357_v12 = vpop.eup %1356 }
 0x4b3   :  { %382 = vrot.lane.b32.xlu0 %v1357_v12, %s1383_s9 }
 0x525   :  { %v383_v13 = vpop.permute.xlu0 %382 }
 0x526   :  { %v1575_v14 = vmul.f32 %v1355_v4, %v383_v13 }
 0x528   :  { %v397_v15 = vpack.c.bf16 %v1575_v14, %v1575_v14 }
 0x52a   :  { %399 = vrot.lane.b32.xlu1 %v397_v15, %s1387_s29 }
 0x59c   :  { %v400_v16 = vpop.permute.xlu1 %399 }
 0x59d   :  { %1220 = vmatmul.mubr.msk.bf16.vlgmr.msra.gmra.mxu1 %vm198_vm1, %v400_v16 }
 0x59e   :  { %1232 = vmatpush3.bf16.msra.mxu1 %v1538_v39  ;;  %1235 = vmatprep.mubr.msk.bf16.mxu1 %vm1386_vm0, %v1385_v21 }
 0x59f   :  { %1233 = vmatprep.subr.bf16.mxu1 %v1385_v21 }
 0x5a2   :  { %1234 = vmatpush3.bf16.msra.mxu1 %v1545_v40 }
 0x5a3   :  { %1247 = vmatprep.subr.bf16.mxu1 %v1385_v21 }
 0x65d   :  { %v440_v17 = vpop.f32.mrf.mxu1 }
 0x65e   :  { %v441_v18 = vadd.f32 %v440_v17, %v1524_v32 }
 0x65f   :  { %v1221_v19 = vpop.f32.mrf.mxu1 }
 0x660   :  { %v446_v26 = vadd.f32 %v441_v18, %v1528_v34 }
 0x661   :  { %v443_v27 = vpop.f32.mrf.mxu1 }
 0x662   :  { %v447_v28 = vmax.f32 %v446_v26, 0.0 }
 0x663   :  { %v1222_v29 = vpop.f32.mrf.mxu1 }
 0x664   :  { %v448_v30 = vpack.c.bf16 %v447_v28, %v447_v28 }
 0x666   :  { %1228 = vmatmul.mubr.msk.bf16.vlgmr.msra.gmra.mxu0 %vm198_vm1, %v448_v30 }
 0x667   :  { %1240 = vmatpush3.bf16.msra.mxu0 %v1550_v47  ;;  %1243 = vmatprep.mubr.msk.bf16.mxu0 %vm1386_vm0, %v1385_v21 }
 0x668   :  { %1241 = vmatprep.subr.bf16.mxu0 %v1385_v21 }
 0x66b   :  { %1242 = vmatpush3.bf16.msra.mxu0 %v1557_v52 }
 0x66c   :  { %1255 = vmatprep.subr.bf16.mxu0 %v1385_v21 }
 0x726   :  { %v486_v31 = vpop.f32.mrf.mxu0 }
 0x727   :  { %v492_v32 = vmax.f32 %v486_v31, 0.0 }
 0x728   :  { %v1229_v33 = vpop.f32.mrf.mxu0 }
 0x729   :  { %v493_v36 = vpack.c.bf16 %v492_v32, %v492_v32 }
 0x72a   :  { %v489_v37 = vpop.f32.mrf.mxu0 }
 0x72b   :  { %1236 = vmatmul.mubr.msk.bf16.vlgmr.msra.gmra.mxu1 %vm198_vm1, %v493_v36 }
 0x72c   :  { %v1230_v38 = vpop.f32.mrf.mxu0  ;;  %1248 = vmatpush3.bf16.msra.mxu1 %v1477_v20  ;;  %1251 = vmatprep.mubr.msk.bf16.mxu1 %vm1386_vm0, %v1385_v21 }
 0x72d   :  { %1249 = vmatprep.subr.bf16.mxu1 %v1385_v21 }
 0x730   :  { %1250 = vmatpush3.bf16.msra.mxu1 %v1502_v25 }
 0x731   :  { %1263 = vmatprep.subr.bf16.mxu1 %v1385_v21 }
 0x7eb   :  { %v531_v41 = vpop.f32.mrf.mxu1 }
 0x7ec   :  { %v537_v42 = vmax.f32 %v531_v41, 0.0 }
 0x7ed   :  { %v1237_v43 = vpop.f32.mrf.mxu1 }
 0x7ee   :  { %v538_v44 = vpack.c.bf16 %v537_v42, %v537_v42 }
 0x7ef   :  { %v534_v45 = vpop.f32.mrf.mxu1 }
 0x7f0   :  { %1244 = vmatmul.mubr.msk.bf16.vlgmr.msra.gmra.mxu0 %vm198_vm1, %v538_v44 }
 0x7f1   :  { %1256 = vmatpush3.bf16.msra.mxu0 %v1483_v22  ;;  %v1238_v46 = vpop.f32.mrf.mxu1  ;;  %1259 = vmatprep.mubr.msk.bf16.mxu0 %vm1386_vm0, %v1385_v21 }
 0x7f2   :  { %1257 = vmatprep.subr.bf16.mxu0 %v1385_v21 }
 0x7f5   :  { %1258 = vmatpush3.bf16.msra.mxu0 %v1530_v35 }
 0x7f6   :  { %1271 = vmatprep.subr.bf16.mxu0 %v1385_v21 }
 0x8b0   :  { %v576_v48 = vpop.f32.mrf.mxu0 }
 0x8b1   :  { %v582_v49 = vmax.f32 %v576_v48, 0.0 }
 0x8b2   :  { %v1245_v50 = vpop.f32.mrf.mxu0 }
 0x8b3   :  { %1358 = vtanh.f32 %v582_v49  ;;  %v1135_v55 = vmul.f32 -1.442695, %v582_v49 }
 0x8b4   :  { %v579_v51 = vpop.f32.mrf.mxu0 }
 0x8b5   :  { %1360 = vpow2.f32 %v1135_v55 }
 0x8b6   :  { %v1246_v53 = vpop.f32.mrf.mxu0 }
 0x8c0   :  { %v1359_v54 = vpop.eup %1358 }
 0x8c1   :  { %592 = vrot.lane.b32.xlu0 %v1359_v54, %s1383_s9 }
 0x8c2   :  { %v1361_v56 = vpop.eup %1360 }
 0x8c3   :  { %v586_v57 = vadd.f32 1.0, %v1361_v56 }
 0x8c5   :  { %1362 = vrcp.f32 %v586_v57 }
 0x8d2   :  { %v1363_v58 = vpop.eup %1362 }
 0x8d3   :  { %v590_v61 = vmul.f32 %v1363_v58, %v1571_v11 }
 0x933   :  { %v593_v59 = vpop.permute.xlu0 %592 }
 0x934   :  { %v595_v60 = vmul.f32 %v1363_v58, %v593_v59 }
 0x936   :  { %597 = vrot.lane.b32.xlu1 %v595_v60, %s1383_s9 }
 0x9a8   :  { %v598_v62 = vpop.permute.xlu1 %597 }
 0x9a9   :  { %v1613_v63 = vadd.f32 %v598_v62, %v590_v61 }
 0x9ab   :  { %1364 = vtanh.f32 %v1613_v63 }
 0x9b8   :  { %v1365_v0 = vpop.eup %1364 }
 0x9b9   :  { %603 = vrot.lane.b32.xlu0 %v1365_v0, %s1383_s9 }
 0x9bd   :  { %620 = vrot.lane.b32.xlu0 %v1493_v23, %s1387_s29 }
 0xa2b   :  { %v604_v1 = vpop.permute.xlu0 %603 }
 0xa2c   :  { %v1619_v2 = vmul.f32 %v1363_v58, %v604_v1 }
 0xa2e   :  { %v616_v3 = vpack.c.bf16 %v1619_v2, %v1619_v2 }
 0xa2f   :  { %v621_v5 = vpop.permute.xlu0 %620 }
 0xa30   :  { %618 = vrot.lane.b32.xlu1 %v616_v3, %s1387_s29 }
 0xaa2   :  { %v619_v4 = vpop.permute.xlu1 %618 }
 0xaa3   :  { %1252 = vmatmul.mubr.msk.bf16.vlgmr.msra.gmra.mxu1 %vm198_vm1, %v619_v4 }
 0xaa4   :  { %1264 = vmatpush3.bf16.msra.mxu1 %v1538_v39  ;;  %1267 = vmatprep.mubr.msk.bf16.mxu1 %vm1386_vm0, %v1385_v21 }
 0xaa5   :  { %1265 = vmatprep.subr.bf16.mxu1 %v1385_v21 }
 0xaa8   :  { %1266 = vmatpush3.bf16.msra.mxu1 %v1545_v40 }
 0xaa9   :  { %1279 = vmatprep.subr.bf16.mxu1 %v1385_v21 }
 0xb63   :  { %v660_v6 = vpop.f32.mrf.mxu1 }
 0xb64   :  { %v661_v7 = vadd.f32 %v660_v6, %v621_v5 }
 0xb65   :  { %v1253_v8 = vpop.f32.mrf.mxu1 }
 0xb66   :  { %v666_v10 = vadd.f32 %v661_v7, %v1528_v34 }
 0xb67   :  { %v663_v11 = vpop.f32.mrf.mxu1 }
 0xb68   :  { %v667_v12 = vmax.f32 %v666_v10, 0.0 }
 0xb69   :  { %v1254_v13 = vpop.f32.mrf.mxu1 }
 0xb6a   :  { %v668_v15 = vpack.c.bf16 %v667_v12, %v667_v12 }
 0xb6c   :  { %1260 = vmatmul.mubr.msk.bf16.vlgmr.msra.gmra.mxu0 %vm198_vm1, %v668_v15 }
 0xb6d   :  { %1272 = vmatpush3.bf16.msra.mxu0 %v1550_v47  ;;  %1275 = vmatprep.mubr.msk.bf16.mxu0 %vm1386_vm0, %v1385_v21 }
 0xb6e   :  { %1273 = vmatprep.subr.bf16.mxu0 %v1385_v21 }
 0xb71   :  { %1274 = vmatpush3.bf16.msra.mxu0 %v1557_v52 }
 0xb72   :  { %1287 = vmatprep.subr.bf16.mxu0 %v1385_v21 }
 0xc2c   :  { %v706_v16 = vpop.f32.mrf.mxu0 }
 0xc2d   :  { %v712_v17 = vmax.f32 %v706_v16, 0.0 }
 0xc2e   :  { %v1261_v18 = vpop.f32.mrf.mxu0 }
 0xc2f   :  { %v713_v19 = vpack.c.bf16 %v712_v17, %v712_v17 }
 0xc30   :  { %v709_v26 = vpop.f32.mrf.mxu0 }
 0xc31   :  { %1268 = vmatmul.mubr.msk.bf16.vlgmr.msra.gmra.mxu1 %vm198_vm1, %v713_v19 }
 0xc32   :  { %v1262_v27 = vpop.f32.mrf.mxu0  ;;  %1280 = vmatpush3.bf16.msra.mxu1 %v1477_v20  ;;  %1283 = vmatprep.mubr.msk.bf16.mxu1 %vm1386_vm0, %v1385_v21 }
 0xc33   :  { %1281 = vmatprep.subr.bf16.mxu1 %v1385_v21  ;;  %v386_v27 = vmul.f32 %v1575_v14, %v1495_v24 }
 0xc36   :  { %1282 = vmatpush3.bf16.msra.mxu1 %v1502_v25 }
 0xc37   :  { %1295 = vmatprep.subr.bf16.mxu1 %v1385_v21 }
 0xcf1   :  { %v751_v28 = vpop.f32.mrf.mxu1 }
 0xcf2   :  { %v757_v29 = vmax.f32 %v751_v28, 0.0 }
 0xcf3   :  { %v1269_v30 = vpop.f32.mrf.mxu1 }
 0xcf4   :  { %v758_v31 = vpack.c.bf16 %v757_v29, %v757_v29 }
 0xcf5   :  { %v754_v32 = vpop.f32.mrf.mxu1 }
 0xcf6   :  { %1276 = vmatmul.mubr.msk.bf16.vlgmr.msra.gmra.mxu0 %vm198_vm1, %v758_v31 }
 0xcf7   :  { %1288 = vmatpush3.bf16.msra.mxu0 %v1483_v22  ;;  %v1270_v33 = vpop.f32.mrf.mxu1  ;;  %1291 = vmatprep.mubr.msk.bf16.mxu0 %vm1386_vm0, %v1385_v21 }
 0xcf8   :  { %1289 = vmatprep.subr.bf16.mxu0 %v1385_v21 }
 0xcfb   :  { %1290 = vmatpush3.bf16.msra.mxu0 %v1530_v35 }
 0xcfc   :  { %1303 = vmatprep.subr.bf16.mxu0 %v1385_v21 }
 0xdb6   :  { %v796_v20 = vpop.f32.mrf.mxu0 }
 0xdb7   :  { %v802_v25 = vmax.f32 %v796_v20, 0.0 }
 0xdb8   :  { %v1277_v36 = vpop.f32.mrf.mxu0 }
 0xdb9   :  { %1366 = vtanh.f32 %v802_v25  ;;  %v1140_v22 = vmul.f32 -1.442695, %v802_v25  ;;  %v607_v25 = vmul.f32 %v1619_v2, %v1495_v24 }
 0xdba   :  { %v799_v37 = vpop.f32.mrf.mxu0 }
 0xdbb   :  { %1368 = vpow2.f32 %v1140_v22 }
 0xdbc   :  { %v1278_v38 = vpop.f32.mrf.mxu0 }
 0xdc6   :  { %v1367_v41 = vpop.eup %1366 }
 0xdc7   :  { %812 = vrot.lane.b32.xlu1 %v1367_v41, %s1383_s9 }
 0xdc8   :  { %v1369_v42 = vpop.eup %1368 }
 0xdc9   :  { %v806_v43 = vadd.f32 1.0, %v1369_v42 }
 0xdcb   :  { %1370 = vrcp.f32 %v806_v43 }
 0xdd8   :  { %v1371_v44 = vpop.eup %1370 }
 0xdd9   :  { %v810_v35 = vmul.f32 %v1371_v44, %v1613_v63 }
 0xe39   :  { %v813_v45 = vpop.permute.xlu1 %812 }
 0xe3a   :  { %v815_v46 = vmul.f32 %v1371_v44, %v813_v45 }
 0xe3c   :  { %817 = vrot.lane.b32.xlu0 %v815_v46, %s1383_s9 }
 0xeae   :  { %v818_v48 = vpop.permute.xlu0 %817 }
 0xeaf   :  { %v1656_v49 = vadd.f32 %v818_v48, %v810_v35 }
 0xeb1   :  { %1372 = vtanh.f32 %v1656_v49 }
 0xebe   :  { %v1373_v50 = vpop.eup %1372 }
 0xebf   :  { %823 = vrot.lane.b32.xlu1 %v1373_v50, %s1383_s9 }
 0xec3   :  { %840 = vrot.lane.b32.xlu1 %v1493_v23, %s1383_s9 }
 0xf31   :  { %v824_v51 = vpop.permute.xlu1 %823 }
 0xf32   :  { %v1662_v53 = vmul.f32 %v1371_v44, %v824_v51 }
 0xf34   :  { %v836_v54 = vpack.c.bf16 %v1662_v53, %v1662_v53  ;;  %v827_v28 = vmul.f32 %v1662_v53, %v1495_v24 }
 0xf35   :  { %v841_v23 = vpop.permute.xlu1 %840 }
 0xf36   :  { %838 = vrot.lane.b32.xlu0 %v836_v54, %s1387_s29 }
 0xfa8   :  { %v839_v55 = vpop.permute.xlu0 %838 }
 0xfa9   :  { %1284 = vmatmul.mubr.msk.bf16.vlgmr.msra.gmra.mxu1 %vm198_vm1, %v839_v55 }
 0xfaa   :  { %1296 = vmatpush3.bf16.msra.mxu1 %v1538_v39  ;;  %1299 = vmatprep.mubr.msk.bf16.mxu1 %vm1386_vm0, %v1385_v21 }
 0xfab   :  { %1297 = vmatprep.subr.bf16.mxu1 %v1385_v21 }
 0xfae   :  { %1298 = vmatpush3.bf16.msra.mxu1 %v1545_v40 }
0x1069   :  { %v880_v56 = vpop.f32.mrf.mxu1 }
0x106a   :  { %v881_v57 = vadd.f32 %v880_v56, %v841_v23 }
0x106b   :  { %v1285_v58 = vpop.f32.mrf.mxu1 }
0x106c   :  { %v886_v59 = vadd.f32 %v881_v57, %v1528_v34 }
0x106d   :  { %v883_v60 = vpop.f32.mrf.mxu1 }
0x106e   :  { %v887_v61 = vmax.f32 %v886_v59, 0.0 }
0x106f   :  { %v1286_v62 = vpop.f32.mrf.mxu1 }
0x1070   :  { %v888_v63 = vpack.c.bf16 %v887_v61, %v887_v61 }
0x1072   :  { %1292 = vmatmul.mubr.msk.bf16.vlgmr.msra.gmra.mxu0 %vm198_vm1, %v888_v63 }
0x1073   :  { %1304 = vmatpush3.bf16.msra.mxu0 %v1550_v47  ;;  %1307 = vmatprep.mubr.msk.bf16.mxu0 %vm1386_vm0, %v1385_v21 }
0x1074   :  { %1305 = vmatprep.subr.bf16.mxu0 %v1385_v21 }
0x1077   :  { %1306 = vmatpush3.bf16.msra.mxu0 %v1557_v52 }
0x1132   :  { %v926_v39 = vpop.f32.mrf.mxu0 }
0x1133   :  { %v932_v40 = vmax.f32 %v926_v39, 0.0 }
0x1134   :  { %v1293_v0 = vpop.f32.mrf.mxu0 }
0x1135   :  { %v933_v1 = vpack.c.bf16 %v932_v40, %v932_v40 }
0x1136   :  { %v929_v34 = vpop.f32.mrf.mxu0 }
0x1137   :  { %1300 = vmatmul.mubr.msk.bf16.vlgmr.msra.gmra.mxu1 %vm198_vm1, %v933_v1 }
0x1138   :  { %v1294_v3 = vpop.f32.mrf.mxu0 }
0x11f7   :  { %v971_v4 = vpop.f32.mrf.mxu1 }
0x11f8   :  { %v977_v5 = vmax.f32 %v971_v4, 0.0 }
0x11f9   :  { %v1301_v6 = vpop.f32.mrf.mxu1 }
0x11fa   :  { %v978_v7 = vpack.c.bf16 %v977_v5, %v977_v5 }
0x11fb   :  { %v974_v47 = vpop.f32.mrf.mxu1 }
0x11fc   :  { %1308 = vmatmul.mubr.msk.bf16.vlgmr.msra.gmra.mxu0 %vm198_vm1, %v978_v7 }
0x11fd   :  { %v1302_v8 = vpop.f32.mrf.mxu1 }
0x12bc   :  { %v1016_v10 = vpop.f32.mrf.mxu0 }
0x12bd   :  { %v1022_v21 = vmax.f32 %v1016_v10, 0.0 }
0x12be   :  { %v1309_v11 = vpop.f32.mrf.mxu0 }
0x12bf   :  { %1374 = vtanh.f32 %v1022_v21  ;;  %v1145_v15 = vmul.f32 -1.442695, %v1022_v21 }
0x12c0   :  { %v1019_v52 = vpop.f32.mrf.mxu0 }
0x12c1   :  { %1376 = vpow2.f32 %v1145_v15 }
0x12c2   :  { %v1310_v12 = vpop.f32.mrf.mxu0 }
0x12cc   :  { %v1375_v13 = vpop.eup %1374 }
0x12cd   :  { %1032 = vrot.lane.b32.xlu0 %v1375_v13, %s1383_s9 }
0x12ce   :  { %v1377_v16 = vpop.eup %1376 }
0x12cf   :  { %v1026_v17 = vadd.f32 1.0, %v1377_v16 }
0x12d1   :  { %1378 = vrcp.f32 %v1026_v17 }
0x12de   :  { %v1379_v18 = vpop.eup %1378 }
0x12df   :  { %v1030_v29 = vmul.f32 %v1379_v18, %v1656_v49 }
0x133f   :  { %v1033_v19 = vpop.permute.xlu0 %1032 }
0x1340   :  { %v1035_v26 = vmul.f32 %v1379_v18, %v1033_v19 }
0x1342   :  { %1037 = vrot.lane.b32.xlu1 %v1035_v26, %s1383_s9 }
0x1346   :  { %388 = vrot.lane.b32.xlu1 %v386_v27, %s1387_s29 }
0x134a   :  { %829 = vrot.lane.b32.xlu1 %v827_v28, %s1387_s29 }
0x13b4   :  { %v1038_v30 = vpop.permute.xlu1 %1037 }
0x13b5   :  { %v1040_v31 = vadd.f32 %v1038_v30, %v1030_v29 }
0x13b7   :  { %1380 = vtanh.f32 %v1040_v31 }
0x13b8   :  { %v389_v32 = vpop.permute.xlu1 %388 }
0x13b9   :  { %v392_v33 = vsel %vm391_vm2, %v389_v32, 0.0 }
0x13ba   :  { %393 = vadd.xlane.f32.xlu1 %v392_v33 }
0x13bc   :  { %v830_v42 = vpop.permute.xlu1 %829 }
0x13bd   :  { %v832_v43 = vsel %vm391_vm2, %v830_v42, 0.0 }
0x13c4   :  { %v1381_v20 = vpop.eup %1380 }
0x13c5   :  { %1043 = vrot.lane.b32.xlu0 %v1381_v20, %s1383_s9 }
0x13c9   :  { %609 = vrot.lane.b32.xlu0 %v607_v25, %s1387_s29 }
0x1437   :  { %v1044_v36 = vpop.permute.xlu0 %1043 }
0x1438   :  { %v1046_v37 = vmul.f32 %v1379_v18, %v1044_v36 }
0x143a   :  { %v1047_v38 = vmul.f32 %v1046_v37, %v1495_v24 }
0x143b   :  { %v610_v41 = vpop.permute.xlu0 %609 }
0x143c   :  { %1049 = vrot.lane.b32.xlu0 %v1047_v38, %s1387_s29  ;;  %v612_v22 = vsel %vm391_vm2, %v610_v41, 0.0 }
0x1443   :  { %v394_v44 = vpop.xlane.xlu1 %393 }
0x1444   :  { %v396_v45 = vadd.f32 %v1443_v9, %v394_v44 }
0x145b   :  { %613 = vadd.xlane.f32.xlu0 %v612_v22 }
0x145f   :  { %833 = vadd.xlane.f32.xlu0 %v832_v43 }
0x1475   :  { %1057 = vrot.lane.b32.xlu0 %v1575_v14, %s1387_s29 }
0x1479   :  { %1075 = vrot.lane.b32.xlu0 %v396_v45, %s1387_s29 }
0x14ae   :  { %v1050_v46 = vpop.permute.xlu0 %1049 }
0x14af   :  { %v1052_v24 = vsel %vm391_vm2, %v1050_v46, 0.0 }
0x14b0   :  { %1053 = vadd.xlane.f32.xlu1 %v1052_v24 }
0x14c1   :  { %1061 = vrot.lane.b32.xlu1 %v1619_v2, %s1384_s27 }
0x14c5   :  { %1065 = vrot.lane.b32.xlu1 %v1046_v37, %s1383_s9 }
0x14e4   :  { %v614_v35 = vpop.xlane.xlu0 %613 }
0x14e5   :  { %v615_v48 = vadd.f32 %v1443_v9, %v614_v35 }
0x14e7   :  { %1079 = vrot.lane.b32.xlu1 %v615_v48, %s1388_s1 }
0x14e8   :  { %v834_v49 = vpop.xlane.xlu0 %833 }
0x14e9   :  { %v835_v14 = vadd.f32 %v1443_v9, %v834_v49 }
0x14eb   :  { %1083 = vrot.lane.b32.xlu0 %v835_v14, %s1389_s8 }
0x14ec   :  { %v1058_v54 = vpop.permute.xlu0 %1057 }
0x14f0   :  { %v1076_v58 = vpop.permute.xlu0 %1075 }
0x1539   :  { %v1054_v50 = vpop.xlane.xlu1 %1053 }
0x153a   :  { %v1055_v51 = vadd.f32 %v1443_v9, %v1054_v50 }
0x153c   :  { %1087 = vrot.lane.b32.xlu1 %v1055_v51, %s1390_s10 }
0x153d   :  { %v1062_v55 = vpop.permute.xlu1 %1061 }
0x153e   :  { %v1068_v2 = vsel %vm198_vm1, %v1058_v54, %v1062_v55 }
0x153f   :  { %v1070_v56 = vsel %vm1069_vm3, %v1068_v2, %v1662_v53 }
0x1541   :  { %v1066_v23 = vpop.permute.xlu1 %1065 }
0x1542   :  { %v1072_v57 = vsel %vm1071_vm4, %v1070_v56, %v1066_v23 }
0x1543   :  { %1073 = vst [vmem:[%s1722_s3] sm:$0x3] %v1072_v57 }
0x1559   :  { %v1080_v59 = vpop.permute.xlu1 %1079 }
0x155a   :  { %v1091_v60 = vsel %vm1090_vm5, %v1076_v58, %v1080_v59 }
0x155d   :  { %v1084_v9 = vpop.permute.xlu0 %1083 }
0x155e   :  { %v1093_v61 = vsel %vm1092_vm6, %v1091_v60, %v1084_v9 }
0x15ae   :  { %v1088_v62 = vpop.permute.xlu1 %1087 }
0x15af   :  { %v1095_v63 = vsel %vm1094_vm7, %v1093_v61, %v1088_v62 }
0x15b0   :  { %1097 = vst.msk [vmem:[%s1723_s4] sm:$0x3] %vm1096_vm8, %v1095_v63 }

</bundles_post_ra>
